<compile_context>
chip_gen: v6e
topology: v6e:2x2x1
jax: 0.10.0
libtpu: 0.0.40
codegen_flags: <defaults>
</compile_context>

<pallas_src>
import functools
from math import sqrt

import jax
import jax.numpy as jnp
from jax.experimental import pallas as pl
from jax.experimental.pallas import tpu as pltpu


# ---------------------------------------------------------------------------
# Kernel
# ---------------------------------------------------------------------------
def _mlp_kernel(x_ref, w1_ref, b1_ref, w2_ref, b2_ref, o_ref, acc_ref,
                *, approximate_gelu):
    # x_ref : (tm, dp)  f32/bf16   w1_ref: (dp, tk) bf16   b1_ref: (1, tk) f32
    # w2_ref: (tk, dp)  bf16       b2_ref: (1, dp)  f32
    # o_ref : (tm, dp)  out dtype  acc_ref: (tm, dp) f32 scratch
    k = pl.program_id(1)

    @pl.when(k == 0)
    def _():
        acc_ref[...] = jnp.zeros_like(acc_ref)

    # layer_1 partial: bf16 x bf16 matmul, f32 accumulation on the MXU.
    x = x_ref[...].astype(jnp.bfloat16)
    h = jnp.dot(x, w1_ref[...], preferred_element_type=jnp.float32)
    h = h + b1_ref[...]

    # GELU (elementwise along d_hidden, so splitting the hidden axis is exact).
    if approximate_gelu:
        # tanh approximation -> EUP slot (changes numerics vs torch default).
        h = jax.nn.gelu(h, approximate=True)
    else:
        # exact erf-based GELU, matching torch.nn.functional.gelu default.
        h = 0.5 * h * (1.0 + jax.lax.erf(h * 0.7071067811865476))

    # layer_2 partial: accumulate this hidden block's contribution in f32.
    acc_ref[...] += jnp.dot(h.astype(w2_ref.dtype), w2_ref[...],
                            preferred_element_type=jnp.float32)

    @pl.when(k == pl.num_programs(1) - 1)
    def _():
        # dropout: eval-mode identity.
        o_ref[...] = (acc_ref[...] + b2_ref[...]).astype(o_ref.dtype)


# ---------------------------------------------------------------------------
# Tiling helpers
# ---------------------------------------------------------------------------
def _round_up(n, m):
    return ((n + m - 1) // m) * m


def _pick_tm(M, dp):
    """Pick the M tile and (possibly padded) M.

    Prefers: large tiles (up to 2048), exact divisors of M, and >= 2 grid
    steps so the 'parallel' axis can shard across v7x's two TensorCores.
    Falls back to row padding (never a full-M single block)."""
    cands = (2048, 1024, 512, 256, 128, 64, 32, 16, 8)

    def ok(t):
        # f32 accumulator + output/x tiles stay comfortably inside VMEM.
        return t * dp * 4 <= 8 * 1024 * 1024

    for t in cands:                       # exact divisor, >= 2 grid steps
        if ok(t) and M % t == 0 and M // t >= 2:
            return t, M
    for t in cands:                       # exact divisor, single step (tiny M)
        if ok(t) and M % t == 0:
            return t, M
    for t in cands:                       # no nice divisor: pad rows
        if ok(t) and t <= max(8, M):
            return t, _round_up(max(M, 8), t)
    return 8, _round_up(max(M, 8), 8)


def _pick_tk(dp, hp, tm, budget_bytes=20 * 1024 * 1024):
    """Hidden-dim tile: full hp if the streamed weight blocks fit, otherwise
    the largest lane-aligned divisor of hp that fits (prefers 256-aligned
    tiles to fill the 256x256 MXUs on v6e/v7x)."""
    def fits(tk):
        wblocks = 2 * (dp * tk + tk * dp) * 2   # double-buffered bf16 W1/W2 blocks
        hidden = tm * tk * 4                    # f32 hidden intermediate
        return wblocks + hidden <= budget_bytes

    if fits(hp):
        return hp
    divisors = [d for d in range(128, hp, 128) if hp % d == 0 and fits(d)]
    if not divisors:
        return 128
    aligned256 = [d for d in divisors if d % 256 == 0]
    return max(aligned256) if aligned256 else max(divisors)


# ---------------------------------------------------------------------------
# pallas_call wrapper
# ---------------------------------------------------------------------------
@functools.partial(jax.jit,
                   static_argnames=("tm", "tk", "out_dtype", "approximate_gelu"))
def _mlp_pallas_impl(x_p, w1_p, b1_p, w2_p, b2_p, *, tm, tk, out_dtype,
                     approximate_gelu):
    Mp, dp = x_p.shape
    hp = w1_p.shape[1]
    grid = (Mp // tm, hp // tk)

    out_bytes = jnp.dtype(out_dtype).itemsize
    est = (
        2 * tm * dp * x_p.dtype.itemsize        # x tiles (double buffered)
        + 2 * (dp * tk + tk * dp) * 2           # bf16 W1 / W2 blocks (2-buf)
        + 2 * (tk + dp) * 4                     # bias blocks
        + 2 * tm * dp * out_bytes               # output tiles
        + tm * dp * 4                           # f32 accumulator scratch
        + tm * tk * 4                           # f32 hidden intermediate
    )
    # Cap well below v7x's 64 MiB physical VMEM per TensorCore.
    vmem_limit = int(min(48 * 1024 * 1024, max(32 * 1024 * 1024, 2 * est)))

    kernel = functools.partial(_mlp_kernel, approximate_gelu=approximate_gelu)

    return pl.pallas_call(
        kernel,
        out_shape=jax.ShapeDtypeStruct((Mp, dp), out_dtype),
        grid_spec=pltpu.PrefetchScalarGridSpec(
            num_scalar_prefetch=0,
            grid=grid,
            in_specs=[
                pl.BlockSpec((tm, dp), lambda i, k: (i, 0)),   # x tile (resident across k)
                pl.BlockSpec((dp, tk), lambda i, k: (0, k)),   # W1 column block (streamed)
                pl.BlockSpec((1, tk), lambda i, k: (0, k)),    # b1 block
                pl.BlockSpec((tk, dp), lambda i, k: (k, 0)),   # W2 row block (streamed)
                pl.BlockSpec((1, dp), lambda i, k: (0, 0)),    # b2 (constant)
            ],
            out_specs=pl.BlockSpec((tm, dp), lambda i, k: (i, 0)),
            scratch_shapes=[pltpu.VMEM((tm, dp), jnp.float32)],
        ),
        compiler_params=pltpu.CompilerParams(
            dimension_semantics=("parallel", "arbitrary"),
            vmem_limit_bytes=vmem_limit,
        ),
    )(x_p, w1_p, b1_p, w2_p, b2_p)


def prepare_mlp_params(w1, b1, w2, b2):
    """One-time (load-time) weight preparation: pad features to lane-dense
    multiples of 128 and cast weights to bf16.  Zero padding keeps the math
    exact (GELU(0) = 0; padded output columns are sliced off)."""
    d_model, d_hidden = w1.shape
    dp = _round_up(d_model, 128)
    hp = _round_up(d_hidden, 128)
    return dict(
        w1=jnp.pad(w1, ((0, dp - d_model), (0, hp - d_hidden))).astype(jnp.bfloat16),
        b1=jnp.pad(jnp.reshape(b1, (1, -1)), ((0, 0), (0, hp - d_hidden))).astype(jnp.float32),
        w2=jnp.pad(w2, ((0, hp - d_hidden), (0, dp - d_model))).astype(jnp.bfloat16),
        b2=jnp.pad(jnp.reshape(b2, (1, -1)), ((0, 0), (0, dp - d_model))).astype(jnp.float32),
        d_model=d_model,
        d_hidden=d_hidden,
    )


def mlp_pallas(x2d, params, *, out_dtype=jnp.float32, approximate_gelu=False):
    """x2d: [M, d_model] -> [M, d_model].  params from prepare_mlp_params()."""
    M, d_model = x2d.shape
    assert d_model == params["d_model"]
    dp, hp = params["w1"].shape

    tm, Mp = _pick_tm(M, dp)
    tk = _pick_tk(dp, hp, tm)

    pad_rows = Mp - M
    pad_cols = dp - d_model
    x_p = x2d
    if pad_rows or pad_cols:
        x_p = jnp.pad(x2d, ((0, pad_rows), (0, pad_cols)))

    out_p = _mlp_pallas_impl(
        x_p, params["w1"], params["b1"], params["w2"], params["b2"],
        tm=tm, tk=tk, out_dtype=out_dtype, approximate_gelu=approximate_gelu)

    if pad_rows or pad_cols:
        out_p = out_p[:M, :d_model]
    return out_p


# ---------------------------------------------------------------------------
# Reference + demo
# ---------------------------------------------------------------------------
def init_linear_params(key, in_features, out_features, dtype=jnp.float32):
    """PyTorch-style nn.Linear init: U(-1/sqrt(in), 1/sqrt(in)).
    Weight stored as [in, out] (transposed vs torch's [out, in])."""
    k_w, k_b = jax.random.split(key)
    bound = 1.0 / sqrt(in_features)
    w = jax.random.uniform(k_w, (in_features, out_features), dtype, -bound, bound)
    b = jax.random.uniform(k_b, (1, out_features), dtype, -bound, bound)
    return w, b


def mlp_reference(x, w1, b1, w2, b2):
    h = x @ w1 + b1
    h = 0.5 * h * (1.0 + jax.lax.erf(h / jnp.sqrt(2.0)))
    return h @ w2 + b2   # dropout is identity in eval mode


if __name__ == "__main__":
    # config: d_model=32, d_mlp=4 (-> hidden = 128), dropout=0.1 (identity in eval)
    batch, seq, d_model, d_mlp = 2, 8, 32, 4
    d_hidden = d_model * d_mlp

    key = jax.random.PRNGKey(0)
    k_x, k_l1, k_l2 = jax.random.split(key, 3)

    x = jax.random.normal(k_x, (batch, seq, d_model), dtype=jnp.float32)
    w1, b1 = init_linear_params(k_l1, d_model, d_hidden)
    w2, b2 = init_linear_params(k_l2, d_hidden, d_model)

    # one-time weight preparation (pad + bf16 cast), hoisted out of the call path
    params = prepare_mlp_params(w1, b1, w2, b2)

    # flatten tokens: [batch, seq, d_model] -> [M, d_model]
    x2d = x.reshape(batch * seq, d_model)

    out2d = mlp_pallas(x2d, params)
    out = out2d.reshape(batch, seq, d_model)
    jax.block_until_ready(out)

    # correctness check: reference uses the same bf16-rounded matmul inputs
    # (f32 accumulation), so only accumulation-order noise remains.
    def _rnd(a):
        return a.astype(jnp.bfloat16).astype(jnp.float32)

    ref = mlp_reference(_rnd(x2d), _rnd(w1), b1, _rnd(w2), b2).reshape(batch, seq, d_model)
    assert out.shape == (batch, seq, d_model)
    assert jnp.allclose(out, ref, atol=3e-2, rtol=3e-2), "mismatch vs reference"

    print("KERNEL_OK")
</pallas_src>

<mosaic_0001>
module attributes {stable_mosaic.version = 11 : i64} {
  func.func @_mlp_kernel(%arg0: i32, %arg1: i32, %arg2: memref<8x128xf32, #tpu.memory_space<vmem>>, %arg3: memref<128x128xbf16, #tpu.memory_space<vmem>>, %arg4: memref<1x128xf32, #tpu.memory_space<vmem>>, %arg5: memref<128x128xbf16, #tpu.memory_space<vmem>>, %arg6: memref<1x128xf32, #tpu.memory_space<vmem>>, %arg7: memref<8x128xf32, #tpu.memory_space<vmem>>, %arg8: memref<8x128xf32, #tpu.memory_space<vmem>>) attributes {dimension_semantics = [#tpu.dimension_semantics<parallel>, #tpu.dimension_semantics<arbitrary>], iteration_bounds = array<i64: 2, 1>, scalar_prefetch = 0 : i64, scratch_operands = 1 : i64, tpu.core_type = #tpu.core_type<tc>, window_params = [{transform_indices = @transform_0, window_bounds = array<i64: 8, 128>}, {transform_indices = @transform_1, window_bounds = array<i64: 128, 128>}, {transform_indices = @transform_2, window_bounds = array<i64: 1, 128>}, {transform_indices = @transform_3, window_bounds = array<i64: 128, 128>}, {pipeline_mode = #tpu.pipeline_mode<synchronous>, transform_indices = @transform_4, window_bounds = array<i64: 1, 128>}, {transform_indices = @transform_5, window_bounds = array<i64: 8, 128>}]} {
    %c0_i32 = arith.constant 0 : i32
    %0 = arith.cmpi eq, %arg1, %c0_i32 : i32
    %1 = arith.extui %0 : i1 to i32
    %c0_i32_0 = arith.constant 0 : i32
    %2 = arith.cmpi ne, %1, %c0_i32_0 : i32
    scf.if %2 {
      %cst_18 = arith.constant 0.000000e+00 : f32
      %27 = vector.broadcast %cst_18 : f32 to vector<8x128xf32>
      %c0_19 = arith.constant 0 : index
      %c0_20 = arith.constant 0 : index
      %28 = vector.load %arg8[%c0_19, %c0_20] : memref<8x128xf32, #tpu.memory_space<vmem>>, vector<8x128xf32>
      tpu.vector_store %arg8[%c0_19, %c0_20], %27 {strides = array<i32>} : memref<8x128xf32, #tpu.memory_space<vmem>>, vector<8x128xf32>,
    } else {
    }
    %c0 = arith.constant 0 : index
    %c0_1 = arith.constant 0 : index
    %3 = vector.load %arg2[%c0, %c0_1] : memref<8x128xf32, #tpu.memory_space<vmem>>, vector<8x128xf32>
    %4 = arith.truncf %3 : vector<8x128xf32> to vector<8x128xbf16>
    %c0_2 = arith.constant 0 : index
    %c0_3 = arith.constant 0 : index
    %5 = vector.load %arg3[%c0_2, %c0_3] : memref<128x128xbf16, #tpu.memory_space<vmem>>, vector<128x128xbf16>
    %cst = arith.constant dense<0.000000e+00> : vector<8x128xf32>
    %6 = tpu.matmul %4, %5, %cst {dimension_numbers = #tpu.dot_dimension_numbers<[1], [0], [0], [1], [0, 0, 1, 1], [], []>} : vector<8x128xbf16>, vector<128x128xbf16>, vector<8x128xf32> -> vector<8x128xf32>
    %c0_4 = arith.constant 0 : index
    %c0_5 = arith.constant 0 : index
    %7 = vector.load %arg4[%c0_4, %c0_5] : memref<1x128xf32, #tpu.memory_space<vmem>>, vector<1x128xf32>
    %8 = vector.broadcast %7 : vector<1x128xf32> to vector<8x128xf32>
    %9 = arith.addf %6, %8 : vector<8x128xf32>
    %cst_6 = arith.constant 5.000000e-01 : f32
    %10 = vector.broadcast %cst_6 : f32 to vector<8x128xf32>
    %11 = arith.mulf %10, %9 : vector<8x128xf32>
    %cst_7 = arith.constant 0.707106769 : f32
    %12 = vector.broadcast %cst_7 : f32 to vector<8x128xf32>
    %13 = arith.mulf %9, %12 : vector<8x128xf32>
    %14 = math.erf %13 : vector<8x128xf32>
    %cst_8 = arith.constant 1.000000e+00 : f32
    %15 = vector.broadcast %cst_8 : f32 to vector<8x128xf32>
    %16 = arith.addf %15, %14 : vector<8x128xf32>
    %17 = arith.mulf %11, %16 : vector<8x128xf32>
    %c0_9 = arith.constant 0 : index
    %c0_10 = arith.constant 0 : index
    %18 = vector.load %arg8[%c0_9, %c0_10] : memref<8x128xf32, #tpu.memory_space<vmem>>, vector<8x128xf32>
    %19 = arith.truncf %17 : vector<8x128xf32> to vector<8x128xbf16>
    %c0_11 = arith.constant 0 : index
    %c0_12 = arith.constant 0 : index
    %20 = vector.load %arg5[%c0_11, %c0_12] : memref<128x128xbf16, #tpu.memory_space<vmem>>, vector<128x128xbf16>
    %cst_13 = arith.constant dense<0.000000e+00> : vector<8x128xf32>
    %21 = tpu.matmul %19, %20, %cst_13 {dimension_numbers = #tpu.dot_dimension_numbers<[1], [0], [0], [1], [0, 0, 1, 1], [], []>} : vector<8x128xbf16>, vector<128x128xbf16>, vector<8x128xf32> -> vector<8x128xf32>
    %22 = arith.addf %18, %21 : vector<8x128xf32>
    %c0_14 = arith.constant 0 : index
    %c0_15 = arith.constant 0 : index
    %23 = vector.load %arg8[%c0_14, %c0_15] : memref<8x128xf32, #tpu.memory_space<vmem>>, vector<8x128xf32>
    tpu.vector_store %arg8[%c0_14, %c0_15], %22 {strides = array<i32>} : memref<8x128xf32, #tpu.memory_space<vmem>>, vector<8x128xf32>,
    %c0_i32_16 = arith.constant 0 : i32
    %24 = arith.cmpi eq, %arg1, %c0_i32_16 : i32
    %25 = arith.extui %24 : i1 to i32
    %c0_i32_17 = arith.constant 0 : i32
    %26 = arith.cmpi ne, %25, %c0_i32_17 : i32
    scf.if %26 {
      %c0_18 = arith.constant 0 : index
      %c0_19 = arith.constant 0 : index
      %27 = vector.load %arg8[%c0_18, %c0_19] : memref<8x128xf32, #tpu.memory_space<vmem>>, vector<8x128xf32>
      %c0_20 = arith.constant 0 : index
      %c0_21 = arith.constant 0 : index
      %28 = vector.load %arg6[%c0_20, %c0_21] : memref<1x128xf32, #tpu.memory_space<vmem>>, vector<1x128xf32>
      %29 = vector.broadcast %28 : vector<1x128xf32> to vector<8x128xf32>
      %30 = arith.addf %27, %29 : vector<8x128xf32>
      %c0_22 = arith.constant 0 : index
      %c0_23 = arith.constant 0 : index
      %31 = vector.load %arg7[%c0_22, %c0_23] : memref<8x128xf32, #tpu.memory_space<vmem>>, vector<8x128xf32>
      tpu.vector_store %arg7[%c0_22, %c0_23], %30 {strides = array<i32>} : memref<8x128xf32, #tpu.memory_space<vmem>>, vector<8x128xf32>,
    } else {
    }
    return
  }
  func.func @transform_0(%arg0: i32, %arg1: i32) -> (i32, i32) {
    %c0_i32 = arith.constant 0 : i32
    %c0_i32_0 = arith.constant 0 : i32
    return %arg0, %c0_i32 : i32, i32
  }
  func.func @transform_1(%arg0: i32, %arg1: i32) -> (i32, i32) {
    %c0_i32 = arith.constant 0 : i32
    %c0_i32_0 = arith.constant 0 : i32
    return %c0_i32, %arg1 : i32, i32
  }
  func.func @transform_2(%arg0: i32, %arg1: i32) -> (i32, i32) {
    %c0_i32 = arith.constant 0 : i32
    %c0_i32_0 = arith.constant 0 : i32
    return %c0_i32, %arg1 : i32, i32
  }
  func.func @transform_3(%arg0: i32, %arg1: i32) -> (i32, i32) {
    %c0_i32 = arith.constant 0 : i32
    %c0_i32_0 = arith.constant 0 : i32
    return %arg1, %c0_i32 : i32, i32
  }
  func.func @transform_4(%arg0: i32, %arg1: i32) -> (i32, i32) {
    %c0_i32 = arith.constant 0 : i32
    %c0_i32_0 = arith.constant 0 : i32
    %c0_i32_1 = arith.constant 0 : i32
    return %c0_i32, %c0_i32_0 : i32, i32
  }
  func.func @transform_5(%arg0: i32, %arg1: i32) -> (i32, i32) {
    %c0_i32 = arith.constant 0 : i32
    %c0_i32_0 = arith.constant 0 : i32
    return %arg0, %c0_i32 : i32, i32
  }
}

</mosaic_0001>

<bundles_post_ra>
// kernel: _mlp_pallas_impl.1
= control target key start
LH: loop header
LB: loop body
LE: loop exit
PB: predicated region body
PF: predicated region fallthrough
CT: control target
= control target key end

     0   :  { %s1285_s0 = inlined_call_operand.hbm [shape: f32[16,128], index: 0, kind: input, shape index: {}]   ;;  %s1286_s1 = inlined_call_operand.hbm [shape: bf16[128,128], index: 1, kind: input, shape index: {}]   ;;  %s1287_s2 = inlined_call_operand.vmem [shape: f32[1,128], index: 2, kind: input, shape index: {}]   ;;  %s1288_s3 = inlined_call_operand.hbm [shape: bf16[128,128], index: 3, kind: input, shape index: {}]   ;;  %s1289_s4 = inlined_call_operand.vmem [shape: f32[1,128], index: 4, kind: input, shape index: {}]   ;;  %s1290_s5 = inlined_call_operand.hbm [shape: f32[16,128], index: 5, kind: output, shape index: {}]  }
   0x1   :  { %1294 = sst [smem:[#allocation13_spill]] %s1286_s1 }
   0x2   :  { %10 = vsyncpa [#allocation4], 0 }
   0x3   :  { %12 = vsyncpa [#allocation4 + $0x1], 0 }
   0x4   :  { %13 = vsyncpa [#allocation7], 0 }
   0x5   :  { %14 = vsyncpa [#allocation5], 0 }
   0x6   :  { %16 = vsyncpa [#allocation5 + $0x1], 0  ;;  %s1086_s18 = smov 0   ;;  %s1088_s19 = smov 0  }
   0x7   :  { %s1090_s20 = smov 0   ;;  %s1092_s21 = smov 0  }
   0x8   :  { %s1094_s22 = smov 0   ;;  %s1096_s23 = smov 0  }
   0x9 LB: > { %s683_s24 = sadd.s32 4294967295, %s1046_s23   ;;  %s684_s25 = sadd.s32 4294967294, %s1046_s23   ;;  %s1046_s23 = sphi %s1096_s23, %s22_s23   ;;  %s1042_s22 = sphi %s1094_s22, %s1312_s22   ;;  %s1038_s21 = sphi %s1092_s21, %s1311_s21   ;;  %s1034_s20 = sphi %s1090_s20, %s1310_s20   ;;  %s1030_s19 = sphi %s1088_s19, %s1309_s19   ;;  %s1026_s18 = sphi %s1086_s18, %s1308_s18  }
   0xa   : > { %p54_p0 = scmp.ne.s32.totalorder %s1030_s19, %s1026_s18  ;;  %p1120_p1 = scmp.eq.s32.totalorder %s683_s24, 0 }
   0xb   : > { %p1124_p2 = scmp.eq.s32.totalorder %s683_s24, 1  ;;  %p183_p3 = scmp.eq.s32.totalorder %s684_s25, 1 }
   0xc   : > { %s1295_s26 = scalar_select %p1120_p1, 1, 0 }
   0xd   : > { %p1130_p4 = por %p1120_p1, %p54_p0  ;;  %p685_p5 = scmp.ge.s32.totalorder %s1046_s23, 1 }
   0xe   : > { %p1135_p6 = por %p183_p3, %p54_p0  ;;  %p190_p7 = scmp.lt.s32.totalorder %s1046_s23, 3 }
   0xf   : > { %s1297_s28 = scalar_select %p1130_p4, 1, 0 }
  0x10   : > { %s1298_s29 = scalar_select %p1135_p6, 1, 0 }
  0x11   : > { %p1140_p8 = pnand %p685_p5, %p190_p7  ;;  %s1048_s6 = smov [#allocation6]  }
  0x12   : > { %s204_s7 = sshll.u32 %s1048_s6, 4  ;;  %s1049_s9 = smov [#allocation8]   ;;  %s205_s7 = int_to_ptr.vmem [resolvable:$true] %s204_s7 }
  0x13   : > { %p789_p9 = pneg %p1140_p8  ;;  %s226_s10 = sshll.u32 %s1049_s9, 4  ;;  %s227_s10 = int_to_ptr.vmem [resolvable:$true] %s226_s10 }
  0x14   : > { %s893_s11 = scalar_lea.vmem %s205_s7, 1024  ;;  %p901_p5 = scmp.lt.s32.totalorder %s205_s7, %s205_s7 }
  0x15   : > { %p1149_p11 = pnand %p789_p9, %p1120_p1  ;;  %p894_p13 = scmp.ne.s32.totalorder %s205_s7, %s893_s11 }
  0x16   : > { %p902_p7 = scmp.lt.s32.totalorder %s893_s11, %s893_s11 }
  0x17   : > { %p884_p12 = pneg %p1149_p11 }
  0x18   : > { %p903_p10 = por %p902_p7, %p901_p5 }
  0x19   : > { %p896_p0 = pnand %p894_p13, %p884_p12 }
  0x1b   : > { %p897_p3 = pneg %p896_p0 }
  0x1d   : > { %p904_p9 = pnand %p903_p10, %p897_p3 }
  0x1f   : > { %907 = shalt.err (!%p904_p9)
}
  0x20   : > { %s1050_s12 = smov 64   ;;  %s1051_s13 = smov 4  }
  0x21   : > { %s1301_s1 = sld [smem:[#allocation13_spill]]  ;;  %s919_s16 = scalar_lea.vmem %s227_s10, 1024 }
  0x22   : > { %p920_p6 = scmp.ne.s32.totalorder %s227_s10, %s919_s16  ;;  %p927_p1 = scmp.lt.s32.totalorder %s227_s10, %s227_s10 }
  0x23   : > { %p928_p4 = scmp.lt.s32.totalorder %s919_s16, %s919_s16 }
  0x24   : > { %p922_p13 = pnand %p920_p6, %p884_p12 }
  0x25   : > { %p929_p5 = por %p928_p4, %p927_p1 }
  0x26   : > { %p923_p0 = pneg %p922_p13 }
  0x27   : > { %792 = dma.hbm_to_vmem [thread:$0]  (!%p1149_p11), %s1301_s1, 1024, %s205_s7, [#allocation7], %s1050_s12, %s1050_s12, %s1051_s13  }
  0x28   : > { %p930_p10 = pnand %p929_p5, %p923_p0 }
  0x2a   : > { %933 = shalt.err (!%p930_p10)
}
  0x2b   : > { %795 = dma.hbm_to_vmem [thread:$0]  (!%p1149_p11), %s1288_s3, 1024, %s227_s10, [#allocation7], %s1050_s12, %s1050_s12, %s1051_s13  }
  0x2c   : > { %s34_s25 = sadd.s32 1, %s1042_s22  ;;  %s41_s6 = sadd.s32 1, %s1034_s20 }
  0x2d   : > { %p36_p1 = scmp.ge.s32.totalorder %s34_s25, 2  ;;  %p48_p4 = scmp.ne.s32.totalorder %s1034_s20, %s1030_s19 }
  0x2e   : > { %p49_p6 = scmp.eq.s32.totalorder %s1046_s23, 0  ;;  %p806_p12 = scmp.lt.s32.totalorder %s1046_s23, 2 }
  0x2f   : > { %s1314_s25 = smov (%p36_p1, %s34_s25), 0  ;;  %p1181_p7 = por %p1124_p2, %p48_p4 }
  0x30   : > { %p50_p3 = por %p49_p6, %p48_p4  ;;  %s38_s8 = ssub.s32 %s1042_s22, %s1314_s25 }
  0x31   : > { %s243_s9 = sand.u32 1, %s1034_s20   ;;  %p39_p9 = scmp.eq.s32.totalorder %s38_s8, 0 }
  0x32   : > { %s690_s10 = sshll.u32 %s243_s9, 3  ;;  %s691_s11 = sshll.u32 %s1042_s22, 7 }
  0x33   : > { %s1190_s12 = scalar_select %p39_p9, %s1034_s20, %s41_s6  }
  0x34   : > { %s252_s15 = scalar_lea.hbm %s1285_s0, %s691_s11  ;;  %s247_s16 = scalar_lea.vmem [#allocation3], %s690_s10 }
  0x35   : > { %s254_s17 = sshll.u32 %s247_s16, 4  ;;  %p1197_p11 = pnand %p806_p12, %p50_p3  ;;  %s255_s17 = int_to_ptr.vmem [resolvable:$true] %s254_s17 }
  0x36   : > { %s244_s24 = scalar_lea.sflag [#allocation4], %s243_s9  ;;  %s947_s8 = scalar_lea.vmem %s255_s17, 128 }
  0x37   : > { %p936_p2 = pneg %p1197_p11  ;;  %p948_p13 = scmp.ne.s32.totalorder %s255_s17, %s947_s8 }
  0x38   : > { %s1052_s6 = smov [#allocation3]  }
  0x39   : > { %p950_p0 = pnand %p948_p13, %p936_p2  ;;  %s952_s1 = sshll.u32 %s1052_s6, 4  ;;  %s953_s1 = int_to_ptr.vmem [resolvable:$false] %s952_s1 }
  0x3a   : > { %s954_s11 = scalar_lea.vmem %s953_s1, 256  ;;  %p955_p10 = scmp.lt.s32.totalorder %s255_s17, %s953_s1 }
  0x3b   : > { %p951_p5 = pneg %p950_p0  ;;  %p956_p1 = scmp.lt.s32.totalorder %s954_s11, %s947_s8 }
  0x3d   : > { %p957_p4 = por %p956_p1, %p955_p10 }
  0x3f   : > { %p958_p6 = pnand %p957_p4, %p951_p5 }
  0x41   : > { %961 = shalt.err (!%p958_p6)
}
  0x42   : > { %799 = dma.hbm_to_vmem [thread:$0]  (!%p1197_p11), %s252_s15, 128, %s255_s17, %s244_s24  }
  0x43   : > { %263 = sbr.rel (%p1140_p8) target bundleno = 536 (0x218), region = 40  ;;  %s1208_s9 = sand.u32 (!%p1140_p8), 1, %s1030_s19  }
  0x44   : > { %s693_s10 = sshll.u32 (!%p1140_p8), %s1208_s9, 3  ;;  %s266_s13 = scalar_lea.sflag (!%p1140_p8), [#allocation4], %s1208_s9 }
  0x45   : > { %s1214_s1 = scalar_lea.vmem (!%p1140_p8), [#allocation3], %s693_s10  ;;  %p1304_p12 = scmp.ne.s32.totalorder (!%p1140_p8), %s1297_s28, 0 }
  0x48   : > { %1013 = dma.done.wait (%p1304_p12), %s266_s13, 128  }
  0x49   : > { %1015 = vsyncadd (%p1304_p12), %s266_s13, 4294967168  ;;  %p1305_p3 = scmp.ne.s32.totalorder %s1295_s26, 0 }
  0x4b   : > { %1017 = dma.done.wait (%p1305_p3), [#allocation7], 2048  }
  0x4c   : > { %1019 = vsyncadd (%p1305_p3), [#allocation7], 4294965248  ;;  %v1053_v0 = vmov 0.0   ;;  %vm1054_vm0 = vmmov 0   ;;  %v864_v1 = vld [vmem:[#allocation6 + $0x38] sm:$0xff]   ;;  %v865_v2 = vld [vmem:[#allocation6 + $0x30] sm:$0xff]  }
  0x4d   : > { %737 = vmatprep.subr.bf16.mxu0 %v1053_v0  ;;  %753 = vmatprep.mubr.msk.bf16.mxu0 %vm1054_vm0, %v1053_v0  ;;  %v866_v3 = vld [vmem:[#allocation6 + $0x28] sm:$0xff]   ;;  %v872_v4 = vld [vmem:[#allocation8 + $0x38] sm:$0xff]   ;;  %v867_v5 = vld [vmem:[#allocation6 + $0x20] sm:$0xff]   ;;  %s716_s15 = sshll.u32 %s1038_s21, 7  ;;  %s306_s16 = scalar_lea.vmem [#allocation9], %s693_s10 }
  0x4e   : > { %757 = vmatprep.subr.bf16.mxu1 %v1053_v0  ;;  %773 = vmatprep.mubr.msk.bf16.mxu1 %vm1054_vm0, %v1053_v0  ;;  %v873_v6 = vld [vmem:[#allocation8 + $0x30] sm:$0xff]   ;;  %v868_v7 = vld [vmem:[#allocation6 + $0x18] sm:$0xff]   ;;  %v870_v9 = vld [vmem:[#allocation6 + $0x8] sm:$0xff]   ;;  %s570_s17 = sshll.u32 %s306_s16, 4  ;;  %s1237_s8 = scalar_lea.hbm %s1290_s5, %s716_s15  ;;  %s1239_s17 = int_to_ptr.vmem [resolvable:$true] %s570_s17 }
  0x4f   : > { %738 = vmatpush3.bf16.msra.mxu0 %v864_v1  ;;  %758 = vmatpush3.bf16.msra.mxu1 %v872_v4  ;;  %v869_v8 = vld [vmem:[#allocation6 + $0x10] sm:$0xff]   ;;  %v871_v10 = vld [vmem:[#allocation6] sm:$0xff]   ;;  %v874_v13 = vld [vmem:[#allocation8 + $0x28] sm:$0xff]   ;;  %s557_s6 = scalar_lea.sflag [#allocation5], %s1208_s9  ;;  %s962_s21 = scalar_lea.vmem %s1239_s17, 128 }
  0x50   : > { %739 = vmatprep.subr.bf16.mxu0 %v1053_v0  ;;  %759 = vmatprep.subr.bf16.mxu1 %v1053_v0  ;;  %v317_v11 = vld [vmem:[%s1214_s1] sm:$0xff]  ;;  %v875_v14 = vld [vmem:[#allocation8 + $0x20] sm:$0xff]   ;;  %v878_v17 = vld [vmem:[#allocation8 + $0x8] sm:$0xff]   ;;  %p963_p8 = scmp.ne.s32.totalorder %s1239_s17, %s962_s21  ;;  %s1055_s11 = smov [#allocation9]  }
  0x51   : > { %v318_v12 = vpack.c.bf16 %v317_v11, %v317_v11  ;;  %v876_v15 = vld [vmem:[#allocation8 + $0x18] sm:$0xff]   ;;  %v877_v16 = vld [vmem:[#allocation8 + $0x10] sm:$0xff]   ;;  %v879_v18 = vld [vmem:[#allocation8] sm:$0xff]   ;;  %s966_s10 = sshll.u32 %s1055_s11, 4  ;;  %s967_s10 = int_to_ptr.vmem [resolvable:$false] %s966_s10 }
  0x52   : > { %v697_v19 = vld [vmem:[%s1287_s2] ss:$0 sm:$0xff]  ;;  %p964_p9 = pnand %p963_p8, %p1181_p7  ;;  %s968_s13 = scalar_lea.vmem %s967_s10, 256 }
  0x53   : > { %740 = vmatpush3.bf16.msra.mxu0 %v865_v2  ;;  %760 = vmatpush3.bf16.msra.mxu1 %v873_v6  ;;  %v714_v31 = vld [vmem:[%s1289_s4] ss:$0 sm:$0xff]  ;;  %p969_p2 = scmp.lt.s32.totalorder %s1239_s17, %s967_s10  ;;  %p970_p13 = scmp.lt.s32.totalorder %s968_s13, %s962_s21 }
  0x54   : > { %741 = vmatprep.subr.bf16.mxu0 %v1053_v0  ;;  %761 = vmatprep.subr.bf16.mxu1 %v1053_v0  ;;  %p965_p11 = pneg %p964_p9 }
  0x55   : > { %p971_p0 = por %p970_p13, %p969_p2 }
  0x57   : > { %742 = vmatpush3.bf16.msra.mxu0 %v866_v3  ;;  %762 = vmatpush3.bf16.msra.mxu1 %v874_v13  ;;  %p972_p5 = pnand %p971_p0, %p965_p11 }
  0x58   : > { %743 = vmatprep.subr.bf16.mxu0 %v1053_v0  ;;  %763 = vmatprep.subr.bf16.mxu1 %v1053_v0 }
  0x5b   : > { %744 = vmatpush3.bf16.msra.mxu0 %v867_v5  ;;  %764 = vmatpush3.bf16.msra.mxu1 %v875_v14 }
  0x5c   : > { %745 = vmatprep.subr.bf16.mxu0 %v1053_v0  ;;  %765 = vmatprep.subr.bf16.mxu1 %v1053_v0 }
  0x5f   : > { %746 = vmatpush3.bf16.msra.mxu0 %v868_v7  ;;  %766 = vmatpush3.bf16.msra.mxu1 %v876_v15 }
  0x60   : > { %747 = vmatprep.subr.bf16.mxu0 %v1053_v0  ;;  %767 = vmatprep.subr.bf16.mxu1 %v1053_v0 }
  0x63   : > { %748 = vmatpush3.bf16.msra.mxu0 %v869_v8  ;;  %768 = vmatpush3.bf16.msra.mxu1 %v877_v16 }
  0x64   : > { %749 = vmatprep.subr.bf16.mxu0 %v1053_v0  ;;  %769 = vmatprep.subr.bf16.mxu1 %v1053_v0 }
  0x67   : > { %750 = vmatpush3.bf16.msra.mxu0 %v870_v9  ;;  %770 = vmatpush3.bf16.msra.mxu1 %v878_v17 }
  0x68   : > { %751 = vmatprep.subr.bf16.mxu0 %v1053_v0  ;;  %771 = vmatprep.subr.bf16.mxu1 %v1053_v0 }
  0x6b   : > { %752 = vmatpush3.bf16.msra.mxu0 %v871_v10  ;;  %772 = vmatpush3.bf16.msra.mxu1 %v879_v18 }
  0x6e   : > { %754 = vmatmul.mubr.bf16.vlgmr.msra.gmra.mxu0 %v318_v12 }
 0x12e   : > { %v424_v20 = vpop.f32.mrf.mxu0 }
 0x12f   : > { %v425_v21 = vadd.f32 %v697_v19, %v424_v20 }
 0x130   : > { %v755_v22 = vpop.f32.mrf.mxu0 }
 0x131   : > { %v431_v23 = vmul.f32 0.70710677, %v425_v21  ;;  %v430_v27 = vmul.f32 0.5, %v425_v21 }
 0x132   : > { %v427_v24 = vpop.f32.mrf.mxu0 }
 0x133   : > { %880 = verf.f32 %v431_v23 }
 0x134   : > { %v756_v25 = vpop.f32.mrf.mxu0 }
 0x140   : > { %v881_v26 = vpop.eup %880 }
 0x141   : > { %v433_v28 = vadd.f32 1.0, %v881_v26 }
 0x143   : > { %v434_v29 = vmul.f32 %v433_v28, %v430_v27 }
 0x145   : > { %v436_v30 = vpack.c.bf16 %v434_v29, %v434_v29 }
 0x147   : > { %774 = vmatmul.mubr.bf16.vlgmr.msra.gmra.mxu1 %v436_v30 }
 0x207   : > { %v535_v32 = vpop.f32.mrf.mxu1 }
 0x208   : > { %v554_v33 = vadd.f32 %v714_v31, %v535_v32 }
 0x209   : > { %v775_v34 = vpop.f32.mrf.mxu1 }
 0x20a   : > { %555 = vst [vmem:[%s306_s16] sm:$0xff] %v554_v33 }
 0x20b   : > { %v538_v35 = vpop.f32.mrf.mxu1 }
 0x20c   : > { %975 = shalt.err (!%p972_p5)
}
 0x20d   : > { %s976_s1 = scalar_lea.hbm %s1237_s8, 128  ;;  %s980_s28 = scalar_lea.hbm %s1290_s5, 256 }
 0x20e   : > { %p977_p10 = scmp.ne.s32.totalorder %s1237_s8, %s976_s1  ;;  %p981_p6 = scmp.lt.s32.totalorder %s1237_s8, %s1290_s5 }
 0x20f   : > { %p982_p12 = scmp.lt.s32.totalorder %s980_s28, %s976_s1 }
 0x210   : > { %p978_p1 = pnand %p977_p10, %p1181_p7 }
 0x211   : > { %p983_p3 = por %p982_p12, %p981_p6 }
 0x212   : > { %p979_p4 = pneg %p978_p1 }
 0x214   : > { %p984_p8 = pnand %p983_p3, %p979_p4 }
 0x216   : > { %987 = shalt.err (!%p984_p8)
}
 0x217   : > { %787 = dma.vmem_to_hbm [thread:$0]  (%p1181_p7), %s1239_s17, 128, %s1237_s8, %s557_s6   ;;  %v776_v36 = vpop.f32.mrf.mxu1 }
 0x218 PF: > { %s582_s15 = sand.u32 1, %s1026_s18   ;;  %p1306_p9 = scmp.ne.s32.totalorder %s1298_s29, 0 }
 0x219   : > { %p1307_p11 = scmp.ge.s32.totalorder %s1046_s23, 2  ;;  %s583_s16 = scalar_lea.sflag [#allocation5], %s582_s15 }
 0x21b   : > { %p801_p2 = pnand %p1307_p11, %p1306_p9 }
 0x21d   : > { %p802_p13 = pneg %p801_p2 }
 0x21f   : > { %1021 = dma.done.wait (%p802_p13), %s583_s16, 128  }
 0x220   : > { %1023 = vsyncadd (%p802_p13), %s583_s16, 4294967168  ;;  %s22_s23 = sadd.s32 1, %s1046_s23   ;;  %s1308_s18 = smov %s1030_s19 }
 0x221   : > { %p19_p0 = scmp.ge.s32.totalorder %s22_s23, 4   ;;  %s1309_s19 = smov %s1034_s20 }
 0x222   : > { %s1310_s20 = smov %s1190_s12  ;;  %s1311_s21 = smov %s1042_s22 }
 0x223   : > { %s1312_s22 = smov %s1314_s25  ;;  %21 = sbr.rel (!%p19_p0) target bundleno = 9 (0x9), region = 106 }
 0x228   :  { %588 = vsyncpa [#allocation4], 1 }
 0x229   :  { %590 = vsyncpa [#allocation4 + $0x1], 1 }
 0x22a   :  { %591 = vsyncpa [#allocation7], 1 }
 0x22b   :  { %592 = vsyncpa [#allocation5], 1 }
 0x22c   :  { %594 = vsyncpa [#allocation5 + $0x1], 1 }

</bundles_post_ra>
